<compile_context>
chip_gen: v6e
topology: v6e:2x2x1
jax: 0.10.0
libtpu: 0.0.40
codegen_flags: <defaults>
</compile_context>

<pallas_src>
import jax
import jax.numpy as jnp
from jax import lax
from jax.experimental import pallas as pl
from jax.experimental.pallas import tpu as pltpu

EPS = 1e-5


# ----------------------------- kernel bodies --------------------------------
def _conv_block(x_ref, w_ref, xp_ref):
    """Bias-free width-K 'same' conv of one (C_in, L) block -> f32 (C_out, L).

    xp_ref: (C_in, L + K - 1) VMEM scratch in the matmul compute dtype.  The
    halo columns are zeroed, the block is copied in at offset K//2 (in-VMEM,
    no HBM traffic), and the conv runs as K accumulating
    (C_out, C_in) @ (C_in, L) MXU matmuls into an f32 accumulator.
    """
    c_in, l = x_ref.shape
    k = w_ref.shape[0]
    pad = (k - 1) // 2
    zeros = jnp.zeros((c_in, pad), xp_ref.dtype)
    # Re-zero the halo every step (cheap) so megacore-sharded grids stay safe.
    xp_ref[:, pl.ds(0, pad)] = zeros
    xp_ref[:, pl.ds(l + pad, pad)] = zeros
    xp_ref[:, pl.ds(pad, l)] = x_ref[...].astype(xp_ref.dtype)

    acc = None
    for t in range(k):                                    # static unroll
        part = lax.dot_general(
            w_ref[t], xp_ref[:, pl.ds(t, l)],
            dimension_numbers=(((1,), (0,)), ((), ())),
            preferred_element_type=jnp.float32)
        acc = part if acc is None else acc + part
    return acc                                            # (C_out, L) f32


def _conv_stats_kernel(x_ref, w_ref, sum_ref, sq_ref, xp_ref):
    """Pass 1 (recompute mode): conv + per-batch-row channel sum / sum-of-sq."""
    y = _conv_block(x_ref, w_ref, xp_ref)
    sum_ref[...] = jnp.sum(y, axis=1, keepdims=True)       # (C_out, 1)
    sq_ref[...] = jnp.sum(y * y, axis=1, keepdims=True)


def _conv_stats_store_kernel(x_ref, w_ref, conv_ref, sum_ref, sq_ref, xp_ref):
    """Pass 1 (store mode): stats + store the raw conv for a cheap pass 2."""
    y = _conv_block(x_ref, w_ref, xp_ref)
    conv_ref[...] = y.astype(conv_ref.dtype)
    sum_ref[...] = jnp.sum(y, axis=1, keepdims=True)
    sq_ref[...] = jnp.sum(y * y, axis=1, keepdims=True)


def _conv_bn_relu_kernel(x_ref, w_ref, scale_ref, shift_ref, o_ref, xp_ref):
    """Pass 2 (recompute mode): conv, folded BN affine (one FMA), ReLU."""
    y = _conv_block(x_ref, w_ref, xp_ref)
    o_ref[...] = jnp.maximum(y * scale_ref[...] + shift_ref[...],
                             0.0).astype(o_ref.dtype)


def _bn_relu_kernel(y_ref, scale_ref, shift_ref, o_ref):
    """Pass 2 (store mode): pure FMA + ReLU sweep over the stored conv."""
    y = y_ref[...].astype(jnp.float32)
    o_ref[...] = jnp.maximum(y * scale_ref[...] + shift_ref[...],
                             0.0).astype(o_ref.dtype)


# ------------------------------- wrapper -------------------------------------
def _fuse_conv_weights(weights, kernel_sizes, dtype):
    """Fold the same-padded {3,5,7} convs into one centered width-K kernel.

    Returns (K, C_out, C_in): W[t, o, c] = sum_branches w_branch[o, c, t - off].
    """
    K = max(kernel_sizes)
    C_out, C_in, _ = weights[0].shape
    w = jnp.zeros((K, C_out, C_in), jnp.float32)
    for wi, ks in zip(weights, kernel_sizes):
        off = (K - ks) // 2
        w = w.at[off:off + ks].add(
            jnp.transpose(wi, (2, 0, 1)).astype(jnp.float32))
    return w.astype(dtype)


def multi_scale_conv_layer(x, weights, biases, gamma, beta,
                           kernel_sizes=(3, 5, 7),
                           compute_dtype=jnp.float32,
                           store_intermediate=None):
    """Forward of MultiScaleConvLayer.  x: (N, C_in, L) -> (N, C_out, L) f32.

    `biases` is accepted for API parity but unused: under training-mode
    BatchNorm the per-channel conv bias cancels exactly in the forward output.
    Note: with compute_dtype=bf16, the BN statistics are computed from the
    bf16-rounded conv (self-consistent between passes, slight drift vs f32).
    """
    del biases  # cancels under training-mode BatchNorm (see docstring)
    N, C_in, L = x.shape
    C_out = weights[0].shape[0]
    assert len(weights) == len(kernel_sizes)
    assert all(ks % 2 == 1 for ks in kernel_sizes)
    K = max(kernel_sizes)

    w = _fuse_conv_weights(weights, kernel_sizes, compute_dtype)
    inter_dtype = compute_dtype

    if store_intermediate is None:
        # Store the raw conv for pass 2 only when the intermediate round-trip
        # is cheaper than re-reading x (and re-running the matmul).
        store_intermediate = (2 * C_out * jnp.dtype(inter_dtype).itemsize
                              < C_in * x.dtype.itemsize)

    # Whole L per grid step (lane-dense, no halo chunks / ragged masking).
    assert (C_in + 2 * C_out) * L * 4 < 24 * 1024 * 1024, (
        "L too large for the untiled path; add halo-DMA L tiling")

    grid = (N,)
    x_spec = pl.BlockSpec((None, C_in, L), lambda n: (n, 0, 0))
    w_spec = pl.BlockSpec((K, C_out, C_in), lambda n: (0, 0, 0))
    vec_spec = pl.BlockSpec((C_out, 1), lambda n: (0, 0))
    stat_spec = pl.BlockSpec((None, C_out, 1), lambda n: (n, 0, 0))
    out_spec = pl.BlockSpec((None, C_out, L), lambda n: (n, 0, 0))
    conv_scratch = pltpu.VMEM((C_in, L + K - 1), compute_dtype)

    cparams = pltpu.CompilerParams(
        dimension_semantics=("parallel",),
        vmem_limit_bytes=64 * 1024 * 1024)

    x_bytes = N * C_in * L * x.dtype.itemsize
    inter_bytes = N * C_out * L * jnp.dtype(inter_dtype).itemsize
    out_bytes = N * C_out * L * 4
    stat_bytes = 2 * N * C_out * 4
    conv_flops = 2 * N * L * K * C_in * C_out

    # ---- pass 1: conv + per-batch-row partial channel sums ------------------
    stat_shape = jax.ShapeDtypeStruct((N, C_out, 1), jnp.float32)
    if store_intermediate:
        conv_raw, sums, sqs = pl.pallas_call(
            _conv_stats_store_kernel,
            grid=grid,
            in_specs=[x_spec, w_spec],
            out_specs=(out_spec, stat_spec, stat_spec),
            out_shape=(jax.ShapeDtypeStruct((N, C_out, L), inter_dtype),
                       stat_shape, stat_shape),
            scratch_shapes=[conv_scratch],
            compiler_params=cparams,
            cost_estimate=pl.CostEstimate(
                flops=conv_flops + 4 * N * L * C_out, transcendentals=0,
                bytes_accessed=x_bytes + inter_bytes + stat_bytes),
        )(x, w)
    else:
        conv_raw = None
        sums, sqs = pl.pallas_call(
            _conv_stats_kernel,
            grid=grid,
            in_specs=[x_spec, w_spec],
            out_specs=(stat_spec, stat_spec),
            out_shape=(stat_shape, stat_shape),
            scratch_shapes=[conv_scratch],
            compiler_params=cparams,
            cost_estimate=pl.CostEstimate(
                flops=conv_flops + 4 * N * L * C_out, transcendentals=0,
                bytes_accessed=x_bytes + stat_bytes),
        )(x, w)

    # ---- tiny glue: global training-mode BN stats -> folded scale / shift ---
    cnt = jnp.float32(N * L)
    mean = jnp.sum(sums, axis=0) / cnt                      # (C_out, 1), bias-free
    var = jnp.sum(sqs, axis=0) / cnt - mean * mean
    var = jnp.maximum(var, 0.0)                             # fp-cancellation guard
    inv_std = lax.rsqrt(var + EPS)
    scale = gamma.astype(jnp.float32).reshape(C_out, 1) * inv_std
    shift = beta.astype(jnp.float32).reshape(C_out, 1) - mean * scale
    # TODO(synk): BatchNorm1d running_mean/running_var update not emitted.

    # ---- pass 2: folded BN affine + ReLU, lane-dense store into (N,C_out,L) -
    if store_intermediate:
        out = pl.pallas_call(
            _bn_relu_kernel,
            grid=grid,
            in_specs=[out_spec, vec_spec, vec_spec],
            out_specs=out_spec,
            out_shape=jax.ShapeDtypeStruct((N, C_out, L), jnp.float32),
            compiler_params=cparams,
            cost_estimate=pl.CostEstimate(
                flops=3 * N * L * C_out, transcendentals=0,
                bytes_accessed=inter_bytes + out_bytes),
        )(conv_raw, scale, shift)
    else:
        out = pl.pallas_call(
            _conv_bn_relu_kernel,
            grid=grid,
            in_specs=[x_spec, w_spec, vec_spec, vec_spec],
            out_specs=out_spec,
            out_shape=jax.ShapeDtypeStruct((N, C_out, L), jnp.float32),
            scratch_shapes=[conv_scratch],
            compiler_params=cparams,
            cost_estimate=pl.CostEstimate(
                flops=conv_flops + 3 * N * L * C_out, transcendentals=0,
                bytes_accessed=x_bytes + out_bytes),
        )(x, w, scale, shift)

    return out


# ---------------------------- reference (pure JAX) ---------------------------
def reference_forward(x_ncl, weights, biases, gamma, beta, kernel_sizes=(3, 5, 7)):
    outs = []
    for w, b, ks in zip(weights, biases, kernel_sizes):
        p = ks // 2
        y = lax.conv_general_dilated(
            x_ncl, w, window_strides=(1,), padding=[(p, p)],
            dimension_numbers=("NCH", "OIH", "NCH"))
        outs.append(y + b[None, :, None])
    s = outs[0] + outs[1] + outs[2]
    mean = jnp.mean(s, axis=(0, 2), keepdims=True)
    var = jnp.mean((s - mean) ** 2, axis=(0, 2), keepdims=True)
    yn = (s - mean) / jnp.sqrt(var + EPS)
    yn = yn * gamma[None, :, None] + beta[None, :, None]
    return jnp.maximum(yn, 0.0)


if __name__ == "__main__":
    key = jax.random.PRNGKey(0)
    kernel_sizes = (3, 5, 7)

    def make_params(k, c_in, c_out):
        keys = jax.random.split(k, 2 * len(kernel_sizes) + 2)
        weights, biases = [], []
        for i, ks in enumerate(kernel_sizes):
            bound = 1.0 / (c_in * ks) ** 0.5
            w = jax.random.uniform(keys[2 * i], (c_out, c_in, ks),
                                   minval=-bound, maxval=bound, dtype=jnp.float32)
            b = jax.random.uniform(keys[2 * i + 1], (c_out,),
                                   minval=-bound, maxval=bound, dtype=jnp.float32)
            weights.append(w)
            biases.append(b)
        gamma = 1.0 + 0.1 * jax.random.normal(keys[-2], (c_out,), dtype=jnp.float32)
        beta = 0.1 * jax.random.normal(keys[-1], (c_out,), dtype=jnp.float32)
        return weights, biases, gamma, beta

    fwd = jax.jit(multi_scale_conv_layer,
                  static_argnames=("kernel_sizes", "compute_dtype",
                                   "store_intermediate"))

    # 1) f32 matmul, recompute path (C_out > C_in).
    N, C_in, C_out, L = 2, 4, 8, 16
    k1, k2 = jax.random.split(key)
    x = jax.random.normal(k1, (N, C_in, L), dtype=jnp.float32)
    weights, biases, gamma, beta = make_params(k2, C_in, C_out)
    out = jax.block_until_ready(fwd(x, weights, biases, gamma, beta))
    ref = reference_forward(x, weights, biases, gamma, beta, kernel_sizes)
    assert out.shape == (N, C_out, L)
    assert jnp.allclose(out, ref, atol=2e-4, rtol=2e-4), (
        f"f32 max abs err = {jnp.max(jnp.abs(out - ref))}")

    # 2) bf16 matmul operands (v5e/v6e/v7x MXU fast path); stats/BN/ReLU in f32.
    out_bf = jax.block_until_ready(
        fwd(x, weights, biases, gamma, beta, compute_dtype=jnp.bfloat16))
    assert jnp.allclose(out_bf, ref, atol=5e-2, rtol=5e-2), (
        f"bf16 max abs err = {jnp.max(jnp.abs(out_bf - ref))}")

    # 3) store-intermediate path (pass 2 is a pure FMA+ReLU sweep).
    N3, C_in3, C_out3, L3 = 2, 24, 8, 160
    k3, k4 = jax.random.split(k2)
    x3 = jax.random.normal(k3, (N3, C_in3, L3), dtype=jnp.float32)
    w3, b3, g3, be3 = make_params(k4, C_in3, C_out3)
    out3 = jax.block_until_ready(
        fwd(x3, w3, b3, g3, be3, store_intermediate=True))
    ref3 = reference_forward(x3, w3, b3, g3, be3, kernel_sizes)
    assert out3.shape == (N3, C_out3, L3)
    assert jnp.allclose(out3, ref3, atol=5e-4, rtol=5e-4), (
        f"store-path max abs err = {jnp.max(jnp.abs(out3 - ref3))}")

    print("KERNEL_OK")
</pallas_src>

<mosaic_0001>
module attributes {stable_mosaic.version = 11 : i64} {
  func.func @_conv_stats_kernel(%arg0: i32, %arg1: memref<1x4x16xf32, #tpu.memory_space<vmem>>, %arg2: memref<7x8x4xf32, #tpu.memory_space<vmem>>, %arg3: memref<1x8x1xf32, #tpu.memory_space<vmem>>, %arg4: memref<1x8x1xf32, #tpu.memory_space<vmem>>, %arg5: memref<4x22xf32, #tpu.memory_space<vmem>>) attributes {dimension_semantics = [#tpu.dimension_semantics<parallel>], iteration_bounds = array<i64: 2>, scalar_prefetch = 0 : i64, scratch_operands = 1 : i64, tpu.core_type = #tpu.core_type<tc>, window_params = [{transform_indices = @transform_0, window_bounds = array<i64: 1, 4, 16>}, {pipeline_mode = #tpu.pipeline_mode<synchronous>, transform_indices = @transform_1, window_bounds = array<i64: 7, 8, 4>}, {transform_indices = @transform_2, window_bounds = array<i64: 1, 8, 1>}, {transform_indices = @transform_3, window_bounds = array<i64: 1, 8, 1>}]} {
    %cst = arith.constant 0.000000e+00 : f32
    %0 = vector.broadcast %cst : f32 to vector<4x3xf32>
    %c0 = arith.constant 0 : index
    %c0_0 = arith.constant 0 : index
    %1 = vector.load %arg5[%c0, %c0_0] : memref<4x22xf32, #tpu.memory_space<vmem>>, vector<4x3xf32>
    tpu.vector_store %arg5[%c0, %c0_0], %0 {strides = array<i32>} : memref<4x22xf32, #tpu.memory_space<vmem>>, vector<4x3xf32>,
    %c0_1 = arith.constant 0 : index
    %c19 = arith.constant 19 : index
    %2 = vector.load %arg5[%c0_1, %c19] : memref<4x22xf32, #tpu.memory_space<vmem>>, vector<4x3xf32>
    tpu.vector_store %arg5[%c0_1, %c19], %0 {strides = array<i32>} : memref<4x22xf32, #tpu.memory_space<vmem>>, vector<4x3xf32>,
    %c0_2 = arith.constant 0 : index
    %c0_3 = arith.constant 0 : index
    %c0_4 = arith.constant 0 : index
    %3 = vector.load %arg1[%c0_2, %c0_3, %c0_4] : memref<1x4x16xf32, #tpu.memory_space<vmem>>, vector<1x4x16xf32>
    %4 = vector.shape_cast %3 : vector<1x4x16xf32> to vector<4x16xf32>
    %c0_5 = arith.constant 0 : index
    %c3 = arith.constant 3 : index
    %5 = vector.load %arg5[%c0_5, %c3] : memref<4x22xf32, #tpu.memory_space<vmem>>, vector<4x16xf32>
    tpu.vector_store %arg5[%c0_5, %c3], %4 {strides = array<i32>} : memref<4x22xf32, #tpu.memory_space<vmem>>, vector<4x16xf32>,
    %c0_6 = arith.constant 0 : index
    %c0_7 = arith.constant 0 : index
    %c0_8 = arith.constant 0 : index
    %6 = vector.load %arg2[%c0_6, %c0_7, %c0_8] : memref<7x8x4xf32, #tpu.memory_space<vmem>>, vector<1x8x4xf32>
    %7 = vector.shape_cast %6 : vector<1x8x4xf32> to vector<8x4xf32>
    %c0_9 = arith.constant 0 : index
    %c0_10 = arith.constant 0 : index
    %8 = vector.load %arg5[%c0_9, %c0_10] : memref<4x22xf32, #tpu.memory_space<vmem>>, vector<4x16xf32>
    %cst_11 = arith.constant dense<0.000000e+00> : vector<8x16xf32>
    %9 = tpu.matmul %7, %8, %cst_11 {dimension_numbers = #tpu.dot_dimension_numbers<[1], [0], [0], [1], [0, 0, 1, 1], [], []>} : vector<8x4xf32>, vector<4x16xf32>, vector<8x16xf32> -> vector<8x16xf32>
    %c1 = arith.constant 1 : index
    %c0_12 = arith.constant 0 : index
    %c0_13 = arith.constant 0 : index
    %10 = vector.load %arg2[%c1, %c0_12, %c0_13] : memref<7x8x4xf32, #tpu.memory_space<vmem>>, vector<1x8x4xf32>
    %11 = vector.shape_cast %10 : vector<1x8x4xf32> to vector<8x4xf32>
    %c0_14 = arith.constant 0 : index
    %c1_15 = arith.constant 1 : index
    %12 = vector.load %arg5[%c0_14, %c1_15] : memref<4x22xf32, #tpu.memory_space<vmem>>, vector<4x16xf32>
    %cst_16 = arith.constant dense<0.000000e+00> : vector<8x16xf32>
    %13 = tpu.matmul %11, %12, %cst_16 {dimension_numbers = #tpu.dot_dimension_numbers<[1], [0], [0], [1], [0, 0, 1, 1], [], []>} : vector<8x4xf32>, vector<4x16xf32>, vector<8x16xf32> -> vector<8x16xf32>
    %14 = arith.addf %9, %13 : vector<8x16xf32>
    %c2 = arith.constant 2 : index
    %c0_17 = arith.constant 0 : index
    %c0_18 = arith.constant 0 : index
    %15 = vector.load %arg2[%c2, %c0_17, %c0_18] : memref<7x8x4xf32, #tpu.memory_space<vmem>>, vector<1x8x4xf32>
    %16 = vector.shape_cast %15 : vector<1x8x4xf32> to vector<8x4xf32>
    %c0_19 = arith.constant 0 : index
    %c2_20 = arith.constant 2 : index
    %17 = vector.load %arg5[%c0_19, %c2_20] : memref<4x22xf32, #tpu.memory_space<vmem>>, vector<4x16xf32>
    %cst_21 = arith.constant dense<0.000000e+00> : vector<8x16xf32>
    %18 = tpu.matmul %16, %17, %cst_21 {dimension_numbers = #tpu.dot_dimension_numbers<[1], [0], [0], [1], [0, 0, 1, 1], [], []>} : vector<8x4xf32>, vector<4x16xf32>, vector<8x16xf32> -> vector<8x16xf32>
    %19 = arith.addf %14, %18 : vector<8x16xf32>
    %c3_22 = arith.constant 3 : index
    %c0_23 = arith.constant 0 : index
    %c0_24 = arith.constant 0 : index
    %20 = vector.load %arg2[%c3_22, %c0_23, %c0_24] : memref<7x8x4xf32, #tpu.memory_space<vmem>>, vector<1x8x4xf32>
    %21 = vector.shape_cast %20 : vector<1x8x4xf32> to vector<8x4xf32>
    %c0_25 = arith.constant 0 : index
    %c3_26 = arith.constant 3 : index
    %22 = vector.load %arg5[%c0_25, %c3_26] : memref<4x22xf32, #tpu.memory_space<vmem>>, vector<4x16xf32>
    %cst_27 = arith.constant dense<0.000000e+00> : vector<8x16xf32>
    %23 = tpu.matmul %21, %22, %cst_27 {dimension_numbers = #tpu.dot_dimension_numbers<[1], [0], [0], [1], [0, 0, 1, 1], [], []>} : vector<8x4xf32>, vector<4x16xf32>, vector<8x16xf32> -> vector<8x16xf32>
    %24 = arith.addf %19, %23 : vector<8x16xf32>
    %c4 = arith.constant 4 : index
    %c0_28 = arith.constant 0 : index
    %c0_29 = arith.constant 0 : index
    %25 = vector.load %arg2[%c4, %c0_28, %c0_29] : memref<7x8x4xf32, #tpu.memory_space<vmem>>, vector<1x8x4xf32>
    %26 = vector.shape_cast %25 : vector<1x8x4xf32> to vector<8x4xf32>
    %c0_30 = arith.constant 0 : index
    %c4_31 = arith.constant 4 : index
    %27 = vector.load %arg5[%c0_30, %c4_31] : memref<4x22xf32, #tpu.memory_space<vmem>>, vector<4x16xf32>
    %cst_32 = arith.constant dense<0.000000e+00> : vector<8x16xf32>
    %28 = tpu.matmul %26, %27, %cst_32 {dimension_numbers = #tpu.dot_dimension_numbers<[1], [0], [0], [1], [0, 0, 1, 1], [], []>} : vector<8x4xf32>, vector<4x16xf32>, vector<8x16xf32> -> vector<8x16xf32>
    %29 = arith.addf %24, %28 : vector<8x16xf32>
    %c5 = arith.constant 5 : index
    %c0_33 = arith.constant 0 : index
    %c0_34 = arith.constant 0 : index
    %30 = vector.load %arg2[%c5, %c0_33, %c0_34] : memref<7x8x4xf32, #tpu.memory_space<vmem>>, vector<1x8x4xf32>
    %31 = vector.shape_cast %30 : vector<1x8x4xf32> to vector<8x4xf32>
    %c0_35 = arith.constant 0 : index
    %c5_36 = arith.constant 5 : index
    %32 = vector.load %arg5[%c0_35, %c5_36] : memref<4x22xf32, #tpu.memory_space<vmem>>, vector<4x16xf32>
    %cst_37 = arith.constant dense<0.000000e+00> : vector<8x16xf32>
    %33 = tpu.matmul %31, %32, %cst_37 {dimension_numbers = #tpu.dot_dimension_numbers<[1], [0], [0], [1], [0, 0, 1, 1], [], []>} : vector<8x4xf32>, vector<4x16xf32>, vector<8x16xf32> -> vector<8x16xf32>
    %34 = arith.addf %29, %33 : vector<8x16xf32>
    %c6 = arith.constant 6 : index
    %c0_38 = arith.constant 0 : index
    %c0_39 = arith.constant 0 : index
    %35 = vector.load %arg2[%c6, %c0_38, %c0_39] : memref<7x8x4xf32, #tpu.memory_space<vmem>>, vector<1x8x4xf32>
    %36 = vector.shape_cast %35 : vector<1x8x4xf32> to vector<8x4xf32>
    %c0_40 = arith.constant 0 : index
    %c6_41 = arith.constant 6 : index
    %37 = vector.load %arg5[%c0_40, %c6_41] : memref<4x22xf32, #tpu.memory_space<vmem>>, vector<4x16xf32>
    %cst_42 = arith.constant dense<0.000000e+00> : vector<8x16xf32>
    %38 = tpu.matmul %36, %37, %cst_42 {dimension_numbers = #tpu.dot_dimension_numbers<[1], [0], [0], [1], [0, 0, 1, 1], [], []>} : vector<8x4xf32>, vector<4x16xf32>, vector<8x16xf32> -> vector<8x16xf32>
    %39 = arith.addf %34, %38 : vector<8x16xf32>
    %cst_43 = arith.constant dense<0.000000e+00> : vector<8xf32>
    %40 = vector.multi_reduction <add>, %39, %cst_43 [1] : vector<8x16xf32> to vector<8xf32>
    %41 = vector.shape_cast %40 : vector<8xf32> to vector<8x1xf32>
    %c0_44 = arith.constant 0 : index
    %c0_45 = arith.constant 0 : index
    %c0_46 = arith.constant 0 : index
    %42 = vector.load %arg3[%c0_44, %c0_45, %c0_46] : memref<1x8x1xf32, #tpu.memory_space<vmem>>, vector<1x8x1xf32>
    %43 = vector.shape_cast %42 : vector<1x8x1xf32> to vector<8x1xf32>
    %44 = vector.shape_cast %41 : vector<8x1xf32> to vector<1x8x1xf32>
    tpu.vector_store %arg3[%c0_44, %c0_45, %c0_46], %44 {strides = array<i32>} : memref<1x8x1xf32, #tpu.memory_space<vmem>>, vector<1x8x1xf32>,
    %45 = arith.mulf %39, %39 : vector<8x16xf32>
    %cst_47 = arith.constant dense<0.000000e+00> : vector<8xf32>
    %46 = vector.multi_reduction <add>, %45, %cst_47 [1] : vector<8x16xf32> to vector<8xf32>
    %47 = vector.shape_cast %46 : vector<8xf32> to vector<8x1xf32>
    %c0_48 = arith.constant 0 : index
    %c0_49 = arith.constant 0 : index
    %c0_50 = arith.constant 0 : index
    %48 = vector.load %arg4[%c0_48, %c0_49, %c0_50] : memref<1x8x1xf32, #tpu.memory_space<vmem>>, vector<1x8x1xf32>
    %49 = vector.shape_cast %48 : vector<1x8x1xf32> to vector<8x1xf32>
    %50 = vector.shape_cast %47 : vector<8x1xf32> to vector<1x8x1xf32>
    tpu.vector_store %arg4[%c0_48, %c0_49, %c0_50], %50 {strides = array<i32>} : memref<1x8x1xf32, #tpu.memory_space<vmem>>, vector<1x8x1xf32>,
    return
  }
  func.func @transform_0(%arg0: i32) -> (i32, i32, i32) {
    %c0_i32 = arith.constant 0 : i32
    %c0_i32_0 = arith.constant 0 : i32
    %c0_i32_1 = arith.constant 0 : i32
    return %arg0, %c0_i32, %c0_i32_0 : i32, i32, i32
  }
  func.func @transform_1(%arg0: i32) -> (i32, i32, i32) {
    %c0_i32 = arith.constant 0 : i32
    %c0_i32_0 = arith.constant 0 : i32
    %c0_i32_1 = arith.constant 0 : i32
    %c0_i32_2 = arith.constant 0 : i32
    return %c0_i32, %c0_i32_0, %c0_i32_1 : i32, i32, i32
  }
  func.func @transform_2(%arg0: i32) -> (i32, i32, i32) {
    %c0_i32 = arith.constant 0 : i32
    %c0_i32_0 = arith.constant 0 : i32
    %c0_i32_1 = arith.constant 0 : i32
    return %arg0, %c0_i32, %c0_i32_0 : i32, i32, i32
  }
  func.func @transform_3(%arg0: i32) -> (i32, i32, i32) {
    %c0_i32 = arith.constant 0 : i32
    %c0_i32_0 = arith.constant 0 : i32
    %c0_i32_1 = arith.constant 0 : i32
    return %arg0, %c0_i32, %c0_i32_0 : i32, i32, i32
  }
}

module attributes {stable_mosaic.version = 11 : i64} {
  func.func @_conv_bn_relu_kernel(%arg0: i32, %arg1: memref<1x4x16xf32, #tpu.memory_space<vmem>>, %arg2: memref<7x8x4xf32, #tpu.memory_space<vmem>>, %arg3: memref<8x1xf32, #tpu.memory_space<vmem>>, %arg4: memref<8x1xf32, #tpu.memory_space<vmem>>, %arg5: memref<1x8x16xf32, #tpu.memory_space<vmem>>, %arg6: memref<4x22xf32, #tpu.memory_space<vmem>>) attributes {dimension_semantics = [#tpu.dimension_semantics<parallel>], iteration_bounds = array<i64: 2>, scalar_prefetch = 0 : i64, scratch_operands = 1 : i64, tpu.core_type = #tpu.core_type<tc>, window_params = [{transform_indices = @transform_0, window_bounds = array<i64: 1, 4, 16>}, {pipeline_mode = #tpu.pipeline_mode<synchronous>, transform_indices = @transform_1, window_bounds = array<i64: 7, 8, 4>}, {pipeline_mode = #tpu.pipeline_mode<synchronous>, transform_indices = @transform_2, window_bounds = array<i64: 8, 1>}, {pipeline_mode = #tpu.pipeline_mode<synchronous>, transform_indices = @transform_3, window_bounds = array<i64: 8, 1>}, {transform_indices = @transform_4, window_bounds = array<i64: 1, 8, 16>}]} {
    %cst = arith.constant 0.000000e+00 : f32
    %0 = vector.broadcast %cst : f32 to vector<4x3xf32>
    %c0 = arith.constant 0 : index
    %c0_0 = arith.constant 0 : index
    %1 = vector.load %arg6[%c0, %c0_0] : memref<4x22xf32, #tpu.memory_space<vmem>>, vector<4x3xf32>
    tpu.vector_store %arg6[%c0, %c0_0], %0 {strides = array<i32>} : memref<4x22xf32, #tpu.memory_space<vmem>>, vector<4x3xf32>,
    %c0_1 = arith.constant 0 : index
    %c19 = arith.constant 19 : index
    %2 = vector.load %arg6[%c0_1, %c19] : memref<4x22xf32, #tpu.memory_space<vmem>>, vector<4x3xf32>
    tpu.vector_store %arg6[%c0_1, %c19], %0 {strides = array<i32>} : memref<4x22xf32, #tpu.memory_space<vmem>>, vector<4x3xf32>,
    %c0_2 = arith.constant 0 : index
    %c0_3 = arith.constant 0 : index
    %c0_4 = arith.constant 0 : index
    %3 = vector.load %arg1[%c0_2, %c0_3, %c0_4] : memref<1x4x16xf32, #tpu.memory_space<vmem>>, vector<1x4x16xf32>
    %4 = vector.shape_cast %3 : vector<1x4x16xf32> to vector<4x16xf32>
    %c0_5 = arith.constant 0 : index
    %c3 = arith.constant 3 : index
    %5 = vector.load %arg6[%c0_5, %c3] : memref<4x22xf32, #tpu.memory_space<vmem>>, vector<4x16xf32>
    tpu.vector_store %arg6[%c0_5, %c3], %4 {strides = array<i32>} : memref<4x22xf32, #tpu.memory_space<vmem>>, vector<4x16xf32>,
    %c0_6 = arith.constant 0 : index
    %c0_7 = arith.constant 0 : index
    %c0_8 = arith.constant 0 : index
    %6 = vector.load %arg2[%c0_6, %c0_7, %c0_8] : memref<7x8x4xf32, #tpu.memory_space<vmem>>, vector<1x8x4xf32>
    %7 = vector.shape_cast %6 : vector<1x8x4xf32> to vector<8x4xf32>
    %c0_9 = arith.constant 0 : index
    %c0_10 = arith.constant 0 : index
    %8 = vector.load %arg6[%c0_9, %c0_10] : memref<4x22xf32, #tpu.memory_space<vmem>>, vector<4x16xf32>
    %cst_11 = arith.constant dense<0.000000e+00> : vector<8x16xf32>
    %9 = tpu.matmul %7, %8, %cst_11 {dimension_numbers = #tpu.dot_dimension_numbers<[1], [0], [0], [1], [0, 0, 1, 1], [], []>} : vector<8x4xf32>, vector<4x16xf32>, vector<8x16xf32> -> vector<8x16xf32>
    %c1 = arith.constant 1 : index
    %c0_12 = arith.constant 0 : index
    %c0_13 = arith.constant 0 : index
    %10 = vector.load %arg2[%c1, %c0_12, %c0_13] : memref<7x8x4xf32, #tpu.memory_space<vmem>>, vector<1x8x4xf32>
    %11 = vector.shape_cast %10 : vector<1x8x4xf32> to vector<8x4xf32>
    %c0_14 = arith.constant 0 : index
    %c1_15 = arith.constant 1 : index
    %12 = vector.load %arg6[%c0_14, %c1_15] : memref<4x22xf32, #tpu.memory_space<vmem>>, vector<4x16xf32>
    %cst_16 = arith.constant dense<0.000000e+00> : vector<8x16xf32>
    %13 = tpu.matmul %11, %12, %cst_16 {dimension_numbers = #tpu.dot_dimension_numbers<[1], [0], [0], [1], [0, 0, 1, 1], [], []>} : vector<8x4xf32>, vector<4x16xf32>, vector<8x16xf32> -> vector<8x16xf32>
    %14 = arith.addf %9, %13 : vector<8x16xf32>
    %c2 = arith.constant 2 : index
    %c0_17 = arith.constant 0 : index
    %c0_18 = arith.constant 0 : index
    %15 = vector.load %arg2[%c2, %c0_17, %c0_18] : memref<7x8x4xf32, #tpu.memory_space<vmem>>, vector<1x8x4xf32>
    %16 = vector.shape_cast %15 : vector<1x8x4xf32> to vector<8x4xf32>
    %c0_19 = arith.constant 0 : index
    %c2_20 = arith.constant 2 : index
    %17 = vector.load %arg6[%c0_19, %c2_20] : memref<4x22xf32, #tpu.memory_space<vmem>>, vector<4x16xf32>
    %cst_21 = arith.constant dense<0.000000e+00> : vector<8x16xf32>
    %18 = tpu.matmul %16, %17, %cst_21 {dimension_numbers = #tpu.dot_dimension_numbers<[1], [0], [0], [1], [0, 0, 1, 1], [], []>} : vector<8x4xf32>, vector<4x16xf32>, vector<8x16xf32> -> vector<8x16xf32>
    %19 = arith.addf %14, %18 : vector<8x16xf32>
    %c3_22 = arith.constant 3 : index
    %c0_23 = arith.constant 0 : index
    %c0_24 = arith.constant 0 : index
    %20 = vector.load %arg2[%c3_22, %c0_23, %c0_24] : memref<7x8x4xf32, #tpu.memory_space<vmem>>, vector<1x8x4xf32>
    %21 = vector.shape_cast %20 : vector<1x8x4xf32> to vector<8x4xf32>
    %c0_25 = arith.constant 0 : index
    %c3_26 = arith.constant 3 : index
    %22 = vector.load %arg6[%c0_25, %c3_26] : memref<4x22xf32, #tpu.memory_space<vmem>>, vector<4x16xf32>
    %cst_27 = arith.constant dense<0.000000e+00> : vector<8x16xf32>
    %23 = tpu.matmul %21, %22, %cst_27 {dimension_numbers = #tpu.dot_dimension_numbers<[1], [0], [0], [1], [0, 0, 1, 1], [], []>} : vector<8x4xf32>, vector<4x16xf32>, vector<8x16xf32> -> vector<8x16xf32>
    %24 = arith.addf %19, %23 : vector<8x16xf32>
    %c4 = arith.constant 4 : index
    %c0_28 = arith.constant 0 : index
    %c0_29 = arith.constant 0 : index
    %25 = vector.load %arg2[%c4, %c0_28, %c0_29] : memref<7x8x4xf32, #tpu.memory_space<vmem>>, vector<1x8x4xf32>
    %26 = vector.shape_cast %25 : vector<1x8x4xf32> to vector<8x4xf32>
    %c0_30 = arith.constant 0 : index
    %c4_31 = arith.constant 4 : index
    %27 = vector.load %arg6[%c0_30, %c4_31] : memref<4x22xf32, #tpu.memory_space<vmem>>, vector<4x16xf32>
    %cst_32 = arith.constant dense<0.000000e+00> : vector<8x16xf32>
    %28 = tpu.matmul %26, %27, %cst_32 {dimension_numbers = #tpu.dot_dimension_numbers<[1], [0], [0], [1], [0, 0, 1, 1], [], []>} : vector<8x4xf32>, vector<4x16xf32>, vector<8x16xf32> -> vector<8x16xf32>
    %29 = arith.addf %24, %28 : vector<8x16xf32>
    %c5 = arith.constant 5 : index
    %c0_33 = arith.constant 0 : index
    %c0_34 = arith.constant 0 : index
    %30 = vector.load %arg2[%c5, %c0_33, %c0_34] : memref<7x8x4xf32, #tpu.memory_space<vmem>>, vector<1x8x4xf32>
    %31 = vector.shape_cast %30 : vector<1x8x4xf32> to vector<8x4xf32>
    %c0_35 = arith.constant 0 : index
    %c5_36 = arith.constant 5 : index
    %32 = vector.load %arg6[%c0_35, %c5_36] : memref<4x22xf32, #tpu.memory_space<vmem>>, vector<4x16xf32>
    %cst_37 = arith.constant dense<0.000000e+00> : vector<8x16xf32>
    %33 = tpu.matmul %31, %32, %cst_37 {dimension_numbers = #tpu.dot_dimension_numbers<[1], [0], [0], [1], [0, 0, 1, 1], [], []>} : vector<8x4xf32>, vector<4x16xf32>, vector<8x16xf32> -> vector<8x16xf32>
    %34 = arith.addf %29, %33 : vector<8x16xf32>
    %c6 = arith.constant 6 : index
    %c0_38 = arith.constant 0 : index
    %c0_39 = arith.constant 0 : index
    %35 = vector.load %arg2[%c6, %c0_38, %c0_39] : memref<7x8x4xf32, #tpu.memory_space<vmem>>, vector<1x8x4xf32>
    %36 = vector.shape_cast %35 : vector<1x8x4xf32> to vector<8x4xf32>
    %c0_40 = arith.constant 0 : index
    %c6_41 = arith.constant 6 : index
    %37 = vector.load %arg6[%c0_40, %c6_41] : memref<4x22xf32, #tpu.memory_space<vmem>>, vector<4x16xf32>
    %cst_42 = arith.constant dense<0.000000e+00> : vector<8x16xf32>
    %38 = tpu.matmul %36, %37, %cst_42 {dimension_numbers = #tpu.dot_dimension_numbers<[1], [0], [0], [1], [0, 0, 1, 1], [], []>} : vector<8x4xf32>, vector<4x16xf32>, vector<8x16xf32> -> vector<8x16xf32>
    %39 = arith.addf %34, %38 : vector<8x16xf32>
    %c0_43 = arith.constant 0 : index
    %c0_44 = arith.constant 0 : index
    %40 = vector.load %arg3[%c0_43, %c0_44] : memref<8x1xf32, #tpu.memory_space<vmem>>, vector<8x1xf32>
    %41 = vector.broadcast %40 : vector<8x1xf32> to vector<8x16xf32>
    %42 = arith.mulf %39, %41 : vector<8x16xf32>
    %c0_45 = arith.constant 0 : index
    %c0_46 = arith.constant 0 : index
    %43 = vector.load %arg4[%c0_45, %c0_46] : memref<8x1xf32, #tpu.memory_space<vmem>>, vector<8x1xf32>
    %44 = vector.broadcast %43 : vector<8x1xf32> to vector<8x16xf32>
    %45 = arith.addf %42, %44 : vector<8x16xf32>
    %cst_47 = arith.constant 0.000000e+00 : f32
    %46 = vector.broadcast %cst_47 : f32 to vector<8x16xf32>
    %47 = arith.maximumf %45, %46 : vector<8x16xf32>
    %c0_48 = arith.constant 0 : index
    %c0_49 = arith.constant 0 : index
    %c0_50 = arith.constant 0 : index
    %48 = vector.load %arg5[%c0_48, %c0_49, %c0_50] : memref<1x8x16xf32, #tpu.memory_space<vmem>>, vector<1x8x16xf32>
    %49 = vector.shape_cast %48 : vector<1x8x16xf32> to vector<8x16xf32>
    %50 = vector.shape_cast %47 : vector<8x16xf32> to vector<1x8x16xf32>
    tpu.vector_store %arg5[%c0_48, %c0_49, %c0_50], %50 {strides = array<i32>} : memref<1x8x16xf32, #tpu.memory_space<vmem>>, vector<1x8x16xf32>,
    return
  }
  func.func @transform_0(%arg0: i32) -> (i32, i32, i32) {
    %c0_i32 = arith.constant 0 : i32
    %c0_i32_0 = arith.constant 0 : i32
    %c0_i32_1 = arith.constant 0 : i32
    return %arg0, %c0_i32, %c0_i32_0 : i32, i32, i32
  }
  func.func @transform_1(%arg0: i32) -> (i32, i32, i32) {
    %c0_i32 = arith.constant 0 : i32
    %c0_i32_0 = arith.constant 0 : i32
    %c0_i32_1 = arith.constant 0 : i32
    %c0_i32_2 = arith.constant 0 : i32
    return %c0_i32, %c0_i32_0, %c0_i32_1 : i32, i32, i32
  }
  func.func @transform_2(%arg0: i32) -> (i32, i32) {
    %c0_i32 = arith.constant 0 : i32
    %c0_i32_0 = arith.constant 0 : i32
    %c0_i32_1 = arith.constant 0 : i32
    return %c0_i32, %c0_i32_0 : i32, i32
  }
  func.func @transform_3(%arg0: i32) -> (i32, i32) {
    %c0_i32 = arith.constant 0 : i32
    %c0_i32_0 = arith.constant 0 : i32
    %c0_i32_1 = arith.constant 0 : i32
    return %c0_i32, %c0_i32_0 : i32, i32
  }
  func.func @transform_4(%arg0: i32) -> (i32, i32, i32) {
    %c0_i32 = arith.constant 0 : i32
    %c0_i32_0 = arith.constant 0 : i32
    %c0_i32_1 = arith.constant 0 : i32
    return %arg0, %c0_i32, %c0_i32_0 : i32, i32, i32
  }
}

</mosaic_0001>

<bundles_post_ra>
// kernel: multi_scale_conv_layer.2
= control target key start
LH: loop header
LB: loop body
LE: loop exit
PB: predicated region body
PF: predicated region fallthrough
CT: control target
= control target key end

     0   :  { %s975_s12 = smov 0   ;;  %s1057_s0 = inlined_call_operand.vmem [shape: f32[2,4,16], index: 0, kind: input, shape index: {}]   ;;  %s1058_s1 = inlined_call_operand.vmem [shape: f32[7,8,4], index: 1, kind: input, shape index: {}]   ;;  %s1059_s2 = inlined_call_operand.vmem [shape: f32[2,8,1], index: 2, kind: output, shape index: {0}]   ;;  %s1060_s3 = inlined_call_operand.vmem [shape: f32[2,8,1], index: 3, kind: output, shape index: {1}]  }
   0x1 LB: > { %s842_s13 = sadd.s32 4294967295, %s944_s12   ;;  %p846_p0 = scmp.ge.s32.totalorder %s944_s12, 1  ;;  %s944_s12 = sphi %s975_s12, %s14_s12  }
   0x2   : > { %p139_p1 = scmp.lt.s32.totalorder %s944_s12, 3 }
   0x4   : > { %p140_p2 = pnand %p846_p0, %p139_p1 }
   0x5   : > { %p165_p3 = scmp.lt.s32.totalorder (!%p140_p2), %s842_s13, 1  ;;  %s947_s18 = smov (!%p140_p2), 3  }
   0x6   : > { %143 = sbr.rel (%p140_p2) target bundleno = 603 (0x25b), region = 28  ;;  %s949_s21 = smov (!%p140_p2), 126  }
   0x7   : > { %s950_s22 = smov (!%p140_p2), 127   ;;  %s951_s23 = smov (!%p140_p2), 125  }
   0x8   : > { %s952_s24 = smov (!%p140_p2), 124   ;;  %s953_s25 = smov (!%p140_p2), 123  }
   0x9   : > { %s954_s26 = smov (!%p140_p2), 122  }
   0xb   : > { %vm177_vm0 = vcmask 19456   ;;  %vm179_vm1 = vcmask 175256   ;;  %v946_v0 = vmov 0.0   ;;  %s1062_s13 = smov (!%p165_p3, %s842_s13), 1  ;;  %vm948_vm2 = vmmov 0   ;;  %v188_v4 = vld [vmem:[%s1058_s1] sm:$0xff] }
   0xc   : > { %178 = vst.msk [vmem:[#allocation2] sm:$0xf] %vm177_vm0, %v946_v0  ;;  %891 = vmatprep.subr.mxu1 %v946_v0  ;;  %886 = vmatprep.subr.mxu0 %v946_v0  ;;  %s847_s14 = sshll.u32 %s1062_s13, 2  ;;  %vm186_vm3 = vcmask 150552   ;;  %vm199_vm4 = vcmask 1043456   ;;  %vm195_vm5 = vcmask 31744  }
   0xd   : > { %180 = vst.msk [vmem:[#allocation2] sm:$0xf] %vm179_vm1, %v946_v0  ;;  %s168_s17 = scalar_lea.vmem %s1057_s0, %s847_s14  ;;  %888 = vmatprep.mubr.msk.f32.mxu0 %vm948_vm2, %v946_v0  ;;  %893 = vmatprep.mubr.msk.f32.mxu1 %vm948_vm2, %v946_v0  ;;  %v850_v5 = vld [vmem:[%s1058_s1 + $0x8] sm:$0xff]  ;;  %v855_v8 = vld [vmem:[%s1058_s1 + $0x10] sm:$0xff]  ;;  %v858_v9 = vld [vmem:[%s1058_s1 + $0x18] sm:$0xff]  ;;  %vm747_vm6 = vcmask 130048  }
   0xe   : > { %v181_v1 = vld [vmem:[%s168_s17] sm:$0xf]  ;;  %v864_v13 = vld [vmem:[%s1058_s1 + $0x28] sm:$0xff]  ;;  %v867_v16 = vld [vmem:[%s1058_s1 + $0x30] sm:$0xff]  ;;  %s848_s14 = sshll.u32 %s1062_s13, 3  ;;  %vm751_vm7 = vcmask 7168  }
   0xf   : > { %183 = vrot.lane.b32.xlu0 %v181_v1, %s947_s18  ;;  %v861_v12 = vld [vmem:[%s1058_s1 + $0x20] sm:$0xff]  ;;  %s172_s17 = scalar_lea.vmem %s1059_s2, %s848_s14  ;;  %s176_s20 = scalar_lea.vmem %s1060_s3, %s848_s14 }
  0x81   : > { %v184_v2 = vpop.permute.xlu0 %183 }
  0x82   : > { %187 = vst.msk [vmem:[#allocation2] sm:$0xf] %vm186_vm3, %v184_v2 }
  0x89   : > { %v189_v3 = vld [vmem:[#allocation2] sm:$0xf] }
  0x8a   : > { %349 = vrot.lane.b32.xlu1 %v189_v3, %s949_s21  ;;  %193 = vrot.lane.b32.xlu0 %v189_v3, %s950_s22 }
  0x8b   : > { %892 = vmatpush3.msk.msra.mxu1 %vm199_vm4, %v189_v3 }
  0x8c   : > { %894 = vmatmul.mubr.msk.f32.vlgmr.msra.gmra.mxu1 %vm195_vm5, %v188_v4  ;;  %901 = vmatprep.subr.mxu1 %v946_v0 }
  0x8d   : > { %903 = vmatprep.mubr.msk.f32.mxu1 %vm948_vm2, %v946_v0 }
  0x8e   : > { %429 = vrot.lane.b32.xlu1 %v189_v3, %s951_s23  ;;  %509 = vrot.lane.b32.xlu0 %v189_v3, %s952_s24 }
  0x92   : > { %589 = vrot.lane.b32.xlu1 %v189_v3, %s953_s25  ;;  %669 = vrot.lane.b32.xlu0 %v189_v3, %s954_s26 }
  0xfc   : > { %v350_v6 = vpop.permute.xlu1 %349  ;;  %v194_v7 = vpop.permute.xlu0 %193 }
  0xfd   : > { %887 = vmatpush3.msk.msra.mxu0 %vm199_vm4, %v194_v7 }
  0xfe   : > { %889 = vmatmul.mubr.msk.f32.vlgmr.msra.gmra.mxu0 %vm195_vm5, %v850_v5  ;;  %896 = vmatprep.subr.mxu0 %v946_v0 }
  0xff   : > { %897 = vmatpush3.msk.msra.mxu0 %vm199_vm4, %v350_v6  ;;  %898 = vmatprep.mubr.msk.f32.mxu0 %vm948_vm2, %v946_v0 }
 0x100   : > { %v430_v10 = vpop.permute.xlu1 %429  ;;  %v510_v11 = vpop.permute.xlu0 %509  ;;  %906 = vmatprep.subr.mxu0 %v946_v0 }
 0x101   : > { %902 = vmatpush3.msk.msra.mxu1 %vm199_vm4, %v430_v10 }
 0x102   : > { %899 = vmatmul.mubr.msk.f32.vlgmr.msra.gmra.mxu0 %vm195_vm5, %v855_v8  ;;  %904 = vmatmul.mubr.msk.f32.vlgmr.msra.gmra.mxu1 %vm195_vm5, %v858_v9 }
 0x103   : > { %907 = vmatpush3.msk.msra.mxu0 %vm199_vm4, %v510_v11  ;;  %911 = vmatprep.subr.mxu1 %v946_v0 }
 0x104   : > { %v590_v14 = vpop.permute.xlu1 %589  ;;  %v670_v15 = vpop.permute.xlu0 %669  ;;  %908 = vmatprep.mubr.msk.f32.mxu0 %vm948_vm2, %v946_v0  ;;  %916 = vmatprep.subr.mxu0 %v946_v0 }
 0x105   : > { %912 = vmatpush3.msk.msra.mxu1 %vm199_vm4, %v590_v14  ;;  %913 = vmatprep.mubr.msk.f32.mxu1 %vm948_vm2, %v946_v0 }
 0x106   : > { %909 = vmatmul.mubr.msk.f32.vlgmr.msra.gmra.mxu0 %vm195_vm5, %v861_v12  ;;  %914 = vmatmul.mubr.msk.f32.vlgmr.msra.gmra.mxu1 %vm195_vm5, %v864_v13 }
 0x107   : > { %917 = vmatpush3.msk.msra.mxu0 %vm199_vm4, %v670_v15  ;;  %918 = vmatprep.mubr.msk.f32.mxu0 %vm948_vm2, %v946_v0 }
 0x10a   : > { %919 = vmatmul.mubr.msk.f32.vlgmr.msra.gmra.mxu0 %vm195_vm5, %v867_v16 }
 0x14c   : > { %v343_v17 = vpop.f32.mrf.mxu1 }
 0x14e   : > { %v895_v18 = vpop.f32.mrf.mxu1 }
 0x1be   : > { %v268_v19 = vpop.f32.mrf.mxu0 }
 0x1bf   : > { %v344_v21 = vadd.f32 %v343_v17, %v268_v19 }
 0x1c0   : > { %v890_v20 = vpop.f32.mrf.mxu0 }
 0x1c2   : > { %v422_v22 = vpop.f32.mrf.mxu0  ;;  %v502_v23 = vpop.f32.mrf.mxu1 }
 0x1c3   : > { %v426_v24 = vadd.f32 %v422_v22, %v344_v21 }
 0x1c4   : > { %v900_v25 = vpop.f32.mrf.mxu0  ;;  %v905_v26 = vpop.f32.mrf.mxu1 }
 0x1c5   : > { %v506_v27 = vadd.f32 %v502_v23, %v426_v24 }
 0x1c6   : > { %v582_v28 = vpop.f32.mrf.mxu0  ;;  %v662_v29 = vpop.f32.mrf.mxu1 }
 0x1c7   : > { %v586_v30 = vadd.f32 %v582_v28, %v506_v27 }
 0x1c8   : > { %v910_v31 = vpop.f32.mrf.mxu0  ;;  %v915_v32 = vpop.f32.mrf.mxu1 }
 0x1c9   : > { %v666_v33 = vadd.f32 %v662_v29, %v586_v30 }
 0x1ca   : > { %v742_v34 = vpop.f32.mrf.mxu0 }
 0x1cb   : > { %v746_v35 = vadd.f32 %v742_v34, %v666_v33 }
 0x1cc   : > { %v920_v36 = vpop.f32.mrf.mxu0 }
 0x1cd   : > { %v748_v37 = vsel %vm747_vm6, %v746_v35, 0.0  ;;  %v753_v38 = vmul.f32 %v746_v35, %v746_v35 }
 0x1ce   : > { %749 = vadd.xlane.f32.xlu1 %v748_v37 }
 0x1cf   : > { %v754_v39 = vsel %vm747_vm6, %v753_v38, 0.0 }
 0x1d0   : > { %755 = vadd.xlane.f32.xlu0 %v754_v39 }
 0x257   : > { %v750_v40 = vpop.xlane.xlu1 %749 }
 0x258   : > { %752 = vst.msk [vmem:[%s172_s17] sm:$0xff] %vm751_vm7, %v750_v40 }
 0x259   : > { %v756_v41 = vpop.xlane.xlu0 %755 }
 0x25a   : > { %757 = vst.msk [vmem:[%s176_s20] sm:$0xff] %vm751_vm7, %v756_v41 }
 0x25b PF: > { %s14_s12 = sadd.s32 1, %s944_s12  }
 0x25c   : > { %p11_p4 = scmp.ge.s32.totalorder %s14_s12, 4  }
 0x25e   :  { %13 = sbr.rel (!%p11_p4) target bundleno = 1 (0x1), region = 76 }

// kernel: multi_scale_conv_layer.3
= control target key start
LH: loop header
LB: loop body
LE: loop exit
PB: predicated region body
PF: predicated region fallthrough
CT: control target
= control target key end

     0   :  { %9 = vsyncpa [#allocation4], 0  ;;  %s1232_s0 = inlined_call_operand.vmem [shape: f32[2,4,16], index: 0, kind: input, shape index: {}]   ;;  %s1233_s1 = inlined_call_operand.vmem [shape: f32[7,8,4], index: 1, kind: input, shape index: {}]   ;;  %s1234_s2 = inlined_call_operand.vmem [shape: f32[8,1], index: 2, kind: input, shape index: {}]   ;;  %s1235_s3 = inlined_call_operand.vmem [shape: f32[8,1], index: 3, kind: input, shape index: {}]   ;;  %s1236_s4 = inlined_call_operand.hbm [shape: f32[2,8,16], index: 4, kind: output, shape index: {}]  }
   0x1   :  { %11 = vsyncpa [#allocation4 + $0x1], 0  ;;  %s1081_s15 = smov 0   ;;  %s1083_s16 = smov 0  }
   0x2   :  { %s1085_s17 = smov 0   ;;  %s1087_s18 = smov 0  }
   0x3 LB: > { %s1102_s19 = sadd.s32 4294967295, %s1043_s18   ;;  %s853_s20 = sadd.s32 4294967294, %s1043_s18   ;;  %s1043_s18 = sphi %s1087_s18, %s1242_s18   ;;  %s1039_s17 = sphi %s1085_s17, %s1241_s17   ;;  %s1035_s16 = sphi %s1083_s16, %s1240_s16   ;;  %s1031_s15 = sphi %s1081_s15, %s1239_s15  }
   0x4   : > { %s1106_s21 = sadd.s32 1, %s1043_s18   ;;  %s113_s22 = sadd.s32 1, %s1039_s17 }
   0x5   : > { %s110_s23 = ssub.s32 %s1043_s18, %s1106_s21  ;;  %p123_p0 = scmp.ne.s32.totalorder %s1039_s17, %s1035_s16 }
   0x6   : > { %p111_p1 = scmp.eq.s32.totalorder %s110_s23, 0  ;;  %p124_p2 = scmp.eq.s32.totalorder %s1102_s19, 1 }
   0x7   : > { %p129_p3 = scmp.ne.s32.totalorder %s1035_s16, %s1031_s15  ;;  %p130_p4 = scmp.eq.s32.totalorder %s853_s20, 1 }
   0x8   : > { %s1117_s24 = scalar_select %p111_p1, %s1039_s17, %s113_s22  }
   0x9   : > { %p1119_p5 = por %p124_p2, %p123_p0  ;;  %p1123_p6 = por %p130_p4, %p129_p3 }
   0xa   : > { %p856_p7 = scmp.ge.s32.totalorder %s1043_s18, 1  ;;  %p164_p8 = scmp.lt.s32.totalorder %s1043_s18, 3 }
   0xc   : > { %p165_p9 = pnand %p856_p7, %p164_p8 }
   0xd   : > { %p189_p10 = scmp.lt.s32.totalorder (!%p165_p9), %s1102_s19, 1  ;;  %s1046_s6 = smov (!%p165_p9), 3  }
   0xe   : > { %168 = sbr.rel (%p165_p9) target bundleno = 489 (0x1e9), region = 36  ;;  %s1048_s9 = smov (!%p165_p9), 126  }
   0xf   : > { %s1049_s10 = smov (!%p165_p9), 127   ;;  %s1051_s11 = smov (!%p165_p9), 125  }
  0x10   : > { %s1052_s12 = smov (!%p165_p9), 124   ;;  %s1053_s13 = smov (!%p165_p9), 123  }
  0x11   : > { %s1054_s14 = smov (!%p165_p9), 122   ;;  %s880_s22 = sshll.u32 (!%p165_p9), %s1102_s19, 7 }
  0x12   : > { %s792_s30 = scalar_lea.hbm (!%p165_p9), %s1236_s4, %s880_s22  ;;  %s1055_s7 = smov (!%p165_p9), [#allocation3]  }
  0x13   : > { %vm193_vm0 = vcmask 19456   ;;  %vm195_vm1 = vcmask 175256   ;;  %v1045_v0 = vmov 0.0   ;;  %s190_s27 = scalar_select %p189_p10, %s1102_s19, 1  ;;  %vm1047_vm2 = vmmov 0   ;;  %v204_v4 = vld [vmem:[%s1233_s1] sm:$0xff] }
  0x14   : > { %194 = vst.msk [vmem:[#allocation2] sm:$0xf] %vm193_vm0, %v1045_v0  ;;  %902 = vmatprep.subr.mxu1 %v1045_v0  ;;  %897 = vmatprep.subr.mxu0 %v1045_v0  ;;  %vm202_vm3 = vcmask 150552   ;;  %vm215_vm4 = vcmask 1043456   ;;  %vm211_vm5 = vcmask 31744   ;;  %v1050_v5 = vmov 0  }
  0x15   : > { %196 = vst.msk [vmem:[#allocation2] sm:$0xf] %vm195_vm1, %v1045_v0  ;;  %s858_s28 = sshll.u32 %s190_s27, 2  ;;  %899 = vmatprep.mubr.msk.f32.mxu0 %vm1047_vm2, %v1045_v0  ;;  %904 = vmatprep.mubr.msk.f32.mxu1 %vm1047_vm2, %v1045_v0  ;;  %v763_v6 = vld [vmem:[%s1234_s2] sm:$0xff]  ;;  %v859_v8 = vld [vmem:[%s1233_s1 + $0x8] sm:$0xff]  ;;  %v864_v11 = vld [vmem:[%s1233_s1 + $0x10] sm:$0xff] }
  0x16   : > { %s192_s5 = scalar_lea.vmem %s1232_s0, %s858_s28  ;;  %981 = vset.pattern.permute.xlu1 %v1050_v5  ;;  %982 = vset.pattern.permute.xlu0 %v1050_v5  ;;  %v770_v7 = vld [vmem:[%s1235_s3] sm:$0xff]  ;;  %v867_v12 = vld [vmem:[%s1233_s1 + $0x18] sm:$0xff]  ;;  %v873_v16 = vld [vmem:[%s1233_s1 + $0x28] sm:$0xff]  ;;  %vm778_vm6 = vcmask 130048   ;;  %s987_s8 = sshll.u32 %s1055_s7, 4  ;;  %s988_s8 = int_to_ptr.vmem [resolvable:$false] %s987_s8 }
  0x17   : > { %v197_v1 = vld [vmem:[%s192_s5] sm:$0xf]  ;;  %v876_v19 = vld [vmem:[%s1233_s1 + $0x30] sm:$0xff]  ;;  %s989_s19 = scalar_lea.vmem %s988_s8, 256 }
  0x18   : > { %199 = vrot.lane.b32.xlu0 %v197_v1, %s1046_s6  ;;  %v870_v15 = vld [vmem:[%s1233_s1 + $0x20] sm:$0xff] }
  0x8a   : > { %v200_v2 = vpop.permute.xlu0 %199 }
  0x8b   : > { %203 = vst.msk [vmem:[#allocation2] sm:$0xf] %vm202_vm3, %v200_v2 }
  0x92   : > { %v205_v3 = vld [vmem:[#allocation2] sm:$0xf] }
  0x93   : > { %365 = vrot.lane.b32.xlu1 %v205_v3, %s1048_s9  ;;  %209 = vrot.lane.b32.xlu0 %v205_v3, %s1049_s10 }
  0x94   : > { %903 = vmatpush3.msk.msra.mxu1 %vm215_vm4, %v205_v3 }
  0x95   : > { %905 = vmatmul.mubr.msk.f32.vlgmr.msra.gmra.mxu1 %vm211_vm5, %v204_v4  ;;  %912 = vmatprep.subr.mxu1 %v1045_v0 }
  0x96   : > { %914 = vmatprep.mubr.msk.f32.mxu1 %vm1047_vm2, %v1045_v0 }
  0x97   : > { %445 = vrot.lane.b32.xlu1 %v205_v3, %s1051_s11  ;;  %525 = vrot.lane.b32.xlu0 %v205_v3, %s1052_s12 }
  0x9b   : > { %605 = vrot.lane.b32.xlu1 %v205_v3, %s1053_s13  ;;  %685 = vrot.lane.b32.xlu0 %v205_v3, %s1054_s14  ;;  %s186_s14 = sand.u32 1, %s1035_s16  }
  0x9c   : > { %s857_s20 = sshll.u32 %s186_s14, 3  ;;  %s781_s5 = scalar_lea.sflag [#allocation4], %s186_s14 }
  0x9d   : > { %s188_s23 = scalar_lea.vmem [#allocation3], %s857_s20 }
  0x9e   : > { %s794_s27 = sshll.u32 %s188_s23, 4  ;;  %s795_s27 = int_to_ptr.vmem [resolvable:$true] %s794_s27 }
  0x9f   : > { %766 = vperm.xlu1 %981, %v763_v6   ;;  %773 = vperm.xlu0 %982, %v770_v7   ;;  %s983_s6 = scalar_lea.vmem %s795_s27, 128  ;;  %p990_p0 = scmp.lt.s32.totalorder %s795_s27, %s988_s8 }
  0xa0   : > { %p984_p11 = scmp.ne.s32.totalorder %s795_s27, %s983_s6  ;;  %p991_p1 = scmp.lt.s32.totalorder %s989_s19, %s983_s6 }
  0xa2   : > { %p985_p12 = pnand %p984_p11, %p1119_p5  ;;  %p992_p2 = por %p991_p1, %p990_p0 }
  0xa4   : > { %p986_p13 = pneg %p985_p12 }
  0xa6   : > { %p993_p3 = pnand %p992_p2, %p986_p13 }
 0x105   : > { %v366_v9 = vpop.permute.xlu1 %365  ;;  %v210_v10 = vpop.permute.xlu0 %209 }
 0x106   : > { %898 = vmatpush3.msk.msra.mxu0 %vm215_vm4, %v210_v10 }
 0x107   : > { %900 = vmatmul.mubr.msk.f32.vlgmr.msra.gmra.mxu0 %vm211_vm5, %v859_v8  ;;  %907 = vmatprep.subr.mxu0 %v1045_v0 }
 0x108   : > { %908 = vmatpush3.msk.msra.mxu0 %vm215_vm4, %v366_v9  ;;  %909 = vmatprep.mubr.msk.f32.mxu0 %vm1047_vm2, %v1045_v0 }
 0x109   : > { %v446_v13 = vpop.permute.xlu1 %445  ;;  %v526_v14 = vpop.permute.xlu0 %525  ;;  %917 = vmatprep.subr.mxu0 %v1045_v0 }
 0x10a   : > { %913 = vmatpush3.msk.msra.mxu1 %vm215_vm4, %v446_v13 }
 0x10b   : > { %910 = vmatmul.mubr.msk.f32.vlgmr.msra.gmra.mxu0 %vm211_vm5, %v864_v11  ;;  %915 = vmatmul.mubr.msk.f32.vlgmr.msra.gmra.mxu1 %vm211_vm5, %v867_v12 }
 0x10c   : > { %918 = vmatpush3.msk.msra.mxu0 %vm215_vm4, %v526_v14  ;;  %922 = vmatprep.subr.mxu1 %v1045_v0 }
 0x10d   : > { %v606_v17 = vpop.permute.xlu1 %605  ;;  %v686_v18 = vpop.permute.xlu0 %685  ;;  %919 = vmatprep.mubr.msk.f32.mxu0 %vm1047_vm2, %v1045_v0  ;;  %927 = vmatprep.subr.mxu0 %v1045_v0 }
 0x10e   : > { %923 = vmatpush3.msk.msra.mxu1 %vm215_vm4, %v606_v17  ;;  %924 = vmatprep.mubr.msk.f32.mxu1 %vm1047_vm2, %v1045_v0 }
 0x10f   : > { %920 = vmatmul.mubr.msk.f32.vlgmr.msra.gmra.mxu0 %vm211_vm5, %v870_v15  ;;  %925 = vmatmul.mubr.msk.f32.vlgmr.msra.gmra.mxu1 %vm211_vm5, %v873_v16 }
 0x110   : > { %928 = vmatpush3.msk.msra.mxu0 %vm215_vm4, %v686_v18  ;;  %929 = vmatprep.mubr.msk.f32.mxu0 %vm1047_vm2, %v1045_v0 }
 0x113   : > { %930 = vmatmul.mubr.msk.f32.vlgmr.msra.gmra.mxu0 %vm211_vm5, %v876_v19 }
 0x11a   : > { %v767_v38 = vpop.permute.xlu1 %766  ;;  %v774_v41 = vpop.permute.xlu0 %773 }
 0x155   : > { %v359_v20 = vpop.f32.mrf.mxu1 }
 0x157   : > { %v906_v21 = vpop.f32.mrf.mxu1 }
 0x1c7   : > { %v284_v22 = vpop.f32.mrf.mxu0 }
 0x1c8   : > { %v360_v24 = vadd.f32 %v359_v20, %v284_v22 }
 0x1c9   : > { %v901_v23 = vpop.f32.mrf.mxu0 }
 0x1cb   : > { %v438_v25 = vpop.f32.mrf.mxu0  ;;  %v518_v26 = vpop.f32.mrf.mxu1 }
 0x1cc   : > { %v442_v27 = vadd.f32 %v438_v25, %v360_v24 }
 0x1cd   : > { %v911_v28 = vpop.f32.mrf.mxu0  ;;  %v916_v29 = vpop.f32.mrf.mxu1 }
 0x1ce   : > { %v522_v30 = vadd.f32 %v518_v26, %v442_v27 }
 0x1cf   : > { %v598_v31 = vpop.f32.mrf.mxu0  ;;  %v678_v32 = vpop.f32.mrf.mxu1 }
 0x1d0   : > { %v602_v33 = vadd.f32 %v598_v31, %v522_v30 }
 0x1d1   : > { %v921_v34 = vpop.f32.mrf.mxu0  ;;  %v926_v35 = vpop.f32.mrf.mxu1 }
 0x1d2   : > { %v682_v36 = vadd.f32 %v678_v32, %v602_v33 }
 0x1d3   : > { %v758_v37 = vpop.f32.mrf.mxu0 }
 0x1d4   : > { %v762_v39 = vadd.f32 %v758_v37, %v682_v36 }
 0x1d5   : > { %v931_v40 = vpop.f32.mrf.mxu0 }
 0x1d6   : > { %v769_v42 = vmul.f32 %v767_v38, %v762_v39 }
 0x1d8   : > { %v776_v43 = vadd.f32 %v774_v41, %v769_v42 }
 0x1da   : > { %v777_v44 = vmax.f32 %v776_v43, 0.0 }
 0x1dc   : > { %779 = vst.msk [vmem:[%s188_s23] sm:$0xff] %vm778_vm6, %v777_v44 }
 0x1dd   : > { %996 = shalt.err (!%p993_p3)
}
 0x1de   : > { %s997_s9 = scalar_lea.hbm %s792_s30, 128  ;;  %s1001_s12 = scalar_lea.hbm %s1236_s4, 256 }
 0x1df   : > { %p998_p4 = scmp.ne.s32.totalorder %s792_s30, %s997_s9  ;;  %p1002_p9 = scmp.lt.s32.totalorder %s792_s30, %s1236_s4 }
 0x1e0   : > { %p1003_p10 = scmp.lt.s32.totalorder %s1001_s12, %s997_s9 }
 0x1e1   : > { %p999_p7 = pnand %p998_p4, %p1119_p5 }
 0x1e2   : > { %p1004_p11 = por %p1003_p10, %p1002_p9 }
 0x1e3   : > { %p1000_p8 = pneg %p999_p7 }
 0x1e5   : > { %p1005_p12 = pnand %p1004_p11, %p1000_p8 }
 0x1e7   : > { %1008 = shalt.err (!%p1005_p12)
}
 0x1e8   : > { %932 = dma.vmem_to_hbm [thread:$0]  (%p1119_p5), %s795_s27, 128, %s792_s30, %s781_s5  }
 0x1e9 PF: > { %p938_p13 = scmp.ge.s32.totalorder %s1043_s18, 2  ;;  %s806_s20 = sand.u32 1, %s1031_s15  }
 0x1ea   : > { %s807_s22 = scalar_lea.sflag [#allocation4], %s806_s20 }
 0x1eb   : > { %p935_p0 = pnand %p938_p13, %p1123_p6 }
 0x1ed   : > { %p936_p1 = pneg %p935_p0 }
 0x1ef   : > { %1026 = dma.done.wait (%p936_p1), %s807_s22, 128  }
 0x1f0   : > { %1028 = vsyncadd (%p936_p1), %s807_s22, 4294967168  ;;  %p14_p2 = scmp.ge.s32.totalorder %s1106_s21, 4   ;;  %s1239_s15 = smov %s1035_s16 }
 0x1f1   : > { %s1240_s16 = smov %s1039_s17  ;;  %s1241_s17 = smov %s1117_s24 }
 0x1f2   : > { %s1242_s18 = smov %s1106_s21  ;;  %16 = sbr.rel (!%p14_p2) target bundleno = 3 (0x3), region = 77 }
 0x1f7   :  { %812 = vsyncpa [#allocation4], 1 }
 0x1f8   :  { %814 = vsyncpa [#allocation4 + $0x1], 1 }

</bundles_post_ra>
